<compile_context>
chip_gen: v7x
topology: tpu7x:2x2x1
jax: 0.10.0
libtpu: 0.0.40
codegen_flags: <defaults>
</compile_context>

<pallas_src>
import functools

import jax
import jax.numpy as jnp
from jax.experimental import pallas as pl
from jax.experimental.pallas import tpu as pltpu


# ------------------------------ Pallas kernel --------------------------------


def _gcn_fused_kernel(*refs, n_layers, K):
    """Fused forward for ONE graph (grid axis = batch).

    refs layout (all VMEM blocks):
      refs[0]              adj    (N, N)            bf16 normalized adjacency
      refs[1]              x      (N, W)            f32 node features
      refs[2 + 2*l]        w_l    ((K+1)*Fin_l, H)  bf16 flattened hop weights
      refs[3 + 2*l]        b_l    (1, H)            f32 bias
      refs[2 + 2*L]        wr     (1, H)            f32 regressor weight
      refs[3 + 2*L]        br     (1, 1)            f32 regressor bias
      refs[4 + 2*L]        h_out  (N, H)            OUTPUT: final hidden states
      refs[5 + 2*L]        out    (N, 1)            OUTPUT: predictions
    """
    adj_ref, x_ref = refs[0], refs[1]
    layer_refs = refs[2:2 + 2 * n_layers]
    wr_ref = refs[2 + 2 * n_layers]
    br_ref = refs[3 + 2 * n_layers]
    h_out_ref = refs[4 + 2 * n_layers]
    out_ref = refs[5 + 2 * n_layers]

    a = adj_ref[...]                               # (N, N) bf16
    h = x_ref[...].astype(jnp.float32)             # (N, Fin) f32, stays resident

    for li in range(n_layers):
        w_ref = layer_refs[2 * li]                 # ((K+1)*Fin, H) bf16
        b_ref = layer_refs[2 * li + 1]             # (1, H) f32

        hk = h.astype(jnp.bfloat16)
        hops = [hk]
        for _ in range(K):
            # hop propagation on the MXU: bf16 inputs, f32 accumulation
            hk = jnp.dot(a, hk,
                         preferred_element_type=jnp.float32).astype(jnp.bfloat16)
            hops.append(hk)
        xcat = hops[0] if K == 0 else jnp.concatenate(hops, axis=-1)
        # single fused hop-weight matmul instead of K+1 skinny ones
        acc = jnp.dot(xcat, w_ref[...], preferred_element_type=jnp.float32)
        h = jnp.tanh(acc + b_ref[...])             # (N, H) f32

    # TODO(synk): pack h_out into a lane-dense (N*H//128, 128) slab (H=32 < 128
    # lanes -> masked vst) once Mosaic relayout cost is verified at prod size.
    h_out_ref[...] = h.astype(h_out_ref.dtype)

    # Regressor as VPU multiply + lane reduction (avoids a (N,H)@(H,1) MXU
    # mat-vec that would waste 127/128 MXU columns).
    out = jnp.sum(h * wr_ref[...], axis=-1, keepdims=True) + br_ref[...]
    out_ref[...] = out.astype(out_ref.dtype)


def _vmem_limit_bytes(N, W, H, K, n_layers):
    """Rough per-step VMEM budget (double-buffered blocks) with headroom."""
    blk = 2 * (N * N * 2)                          # adj bf16, double buffered
    blk += 2 * (N * W * 4)                         # x block
    fin = W
    for _ in range(n_layers):
        blk += (K + 1) * fin * H * 2 + H * 4       # pinned weights + bias
        fin = H
    blk += H * 4 + 4                               # wr, br
    blk += 2 * (N * H * 4 + N * 4)                 # outputs, double buffered
    work = 4 * N * (K + 1) * max(W, H) * 4         # xcat / acc / h working set
    # clamp: >=16 MiB (lifts v5e default), <=48 MiB (inside v7x's 64 MiB VMEM)
    return int(min(max(4 * (blk + work), 16 << 20), 48 << 20))


def gcn_fused_call(adj, h0, layer_ws, layer_bs, wr, br, *, K):
    """adj: (B, N, N) bf16, h0: (B, N, W) f32, layer_ws[l]: ((K+1)*Fin_l, H) bf16,
    layer_bs[l]: (1, H) f32, wr: (1, H) f32, br: (1, 1) f32.
    Returns (out (B, N, 1) f32, h (B, N, H) f32)."""
    n_layers = len(layer_ws)
    B, N, W = h0.shape
    H = wr.shape[-1]

    inputs = [adj, h0]
    in_specs = [
        pl.BlockSpec((None, N, N), lambda b: (b, 0, 0)),   # adj, per graph
        pl.BlockSpec((None, N, W), lambda b: (b, 0, 0)),   # x, per graph
    ]
    for w, bias in zip(layer_ws, layer_bs):
        inputs += [w, bias]
        # weights pinned across the grid (block index constant -> no re-DMA)
        in_specs += [pl.BlockSpec(w.shape, lambda b: (0, 0)),
                     pl.BlockSpec(bias.shape, lambda b: (0, 0))]
    inputs += [wr, br]
    in_specs += [pl.BlockSpec(wr.shape, lambda b: (0, 0)),
                 pl.BlockSpec(br.shape, lambda b: (0, 0))]

    out_specs = (pl.BlockSpec((None, N, H), lambda b: (b, 0, 0)),
                 pl.BlockSpec((None, N, 1), lambda b: (b, 0, 0)))

    # Advisory cost estimate for XLA's scheduler (per-graph work x B).
    flops, fin = 0, W
    for _ in range(n_layers):
        flops += K * 2 * N * N * fin               # A @ x propagation (K hops)
        flops += 2 * N * (K + 1) * fin * H         # fused hop-weight matmul
        fin = H
    flops += 2 * N * H                             # regressor reduction
    flops *= B
    transcendentals = B * n_layers * N * H         # tanh
    bytes_accessed = (adj.size * 2 + h0.size * 4
                      + sum(w.size * 2 for w in layer_ws)
                      + sum(b.size * 4 for b in layer_bs)
                      + wr.size * 4 + br.size * 4
                      + B * N * H * 4 + B * N * 4)

    kernel = functools.partial(_gcn_fused_kernel, n_layers=n_layers, K=K)
    h_out, out = pl.pallas_call(
        kernel,
        out_shape=(jax.ShapeDtypeStruct((B, N, H), jnp.float32),
                   jax.ShapeDtypeStruct((B, N, 1), jnp.float32)),
        grid_spec=pltpu.PrefetchScalarGridSpec(
            num_scalar_prefetch=0,
            grid=(B,),
            in_specs=in_specs,
            out_specs=out_specs),
        compiler_params=pltpu.CompilerParams(
            dimension_semantics=("parallel",),           # 2 TCs on v7x
            vmem_limit_bytes=_vmem_limit_bytes(N, W, H, K, n_layers)),
        cost_estimate=pl.CostEstimate(flops=flops,
                                      transcendentals=transcendentals,
                                      bytes_accessed=bytes_accessed),
    )(*inputs)
    return out, h_out


# --------------------------------- JAX glue ----------------------------------


def build_batched_norm_adj(edge_index, num_nodes):
    """COO (B, 2, E) -> per-graph normalized adjacency (B, N, N), f32.

    gcn_norm with add_self_loops=False (as PyG TAGConv uses):
      A[b, i, j] = #edges j->i in graph b, deg = in-degree,
      Ahat = D^-1/2 A D^-1/2.
    Per-graph normalization == block-diagonal normalization (disjoint blocks).
    """
    # TODO(synk): validate once against torch_geometric gcn_norm on a directed
    # multigraph example (in- vs out-degree placement).
    B, _, E = edge_index.shape
    src = edge_index[:, 0, :]                              # (B, E)
    dst = edge_index[:, 1, :]
    b_idx = jnp.broadcast_to(jnp.arange(B, dtype=edge_index.dtype)[:, None],
                             (B, E))
    A = jnp.zeros((B, num_nodes, num_nodes), jnp.float32)
    A = A.at[b_idx, dst, src].add(1.0)
    deg = A.sum(axis=2)                                    # in-degree (B, N)
    dinv = jnp.where(deg > 0, jax.lax.rsqrt(deg), 0.0)
    return dinv[:, :, None] * A * dinv[:, None, :]


def init_params(key, window_size, n_layers, hidden_dim, K):
    params = {}
    for li in range(n_layers):
        fin = window_size if li == 0 else hidden_dim
        key, kw, kb = jax.random.split(key, 3)
        params[f"w{li}"] = (
            0.1 * jax.random.normal(kw, (K + 1, fin, hidden_dim), jnp.float32))
        params[f"b{li}"] = (
            0.1 * jax.random.normal(kb, (1, hidden_dim), jnp.float32))
    key, kw, kb = jax.random.split(key, 3)
    params["wr"] = 0.1 * jax.random.normal(kw, (1, hidden_dim), jnp.float32)
    params["br"] = 0.1 * jax.random.normal(kb, (1, 1), jnp.float32)
    return params


def gcn_forward(X, edge_index, params, *, window_size, n_layers, hidden_dim, K):
    """Mirrors GCN.forward.  X: (B, W, N), edge_index: (B, 2, E) int.
    Returns (out (B, N), h (B*N, hidden_dim))."""
    B, W, N = X.shape
    assert W == window_size
    # Same row-major reshape the PyTorch reference does ((B,W,N) -> (B*N, W)),
    # regrouped per graph: rows b*N..b*N+N-1 are exactly graph b's rows.
    h0 = X.reshape(B, N, window_size).astype(jnp.float32)
    # Normalization in f32, then bf16 for the MXU / halved DMA.
    adj = build_batched_norm_adj(edge_index, N).astype(jnp.bfloat16)
    layer_ws = [params[f"w{li}"].reshape(-1, hidden_dim).astype(jnp.bfloat16)
                for li in range(n_layers)]
    layer_bs = [params[f"b{li}"] for li in range(n_layers)]
    out, h = gcn_fused_call(adj, h0, layer_ws, layer_bs,
                            params["wr"], params["br"], K=K)
    return out.reshape(B, N), h.reshape(B * N, hidden_dim)
    # TODO(synk): for a single huge graph (N^2 beyond VMEM even in bf16), keep
    # adj in HBM (memory_space=pl.ANY) and stream row-tiles per hop via
    # pltpu.emit_pipeline with h resident in VMEM scratch.


def gcn_reference(X, edge_index, params, *, window_size, n_layers, hidden_dim, K):
    """Pure-JAX f32 reference with identical semantics (correctness check)."""
    B, W, N = X.shape
    h = X.reshape(B, N, window_size).astype(jnp.float32)
    adj = build_batched_norm_adj(edge_index, N)            # (B, N, N) f32
    for li in range(n_layers):
        w, b = params[f"w{li}"], params[f"b{li}"]
        acc = jnp.einsum("bnf,fh->bnh", h, w[0])
        xk = h
        for k in range(1, K + 1):
            xk = jnp.einsum("bij,bjf->bif", adj, xk)
            acc = acc + jnp.einsum("bnf,fh->bnh", xk, w[k])
        h = jnp.tanh(acc + b)
    out = jnp.einsum("bnh,h->bn", h, params["wr"][0]) + params["br"][0, 0]
    return out, h.reshape(B * N, hidden_dim)


# ----------------------------------- main ------------------------------------

if __name__ == "__main__":
    window_size, n_layers, hidden_dim, K = 5, 3, 32, 1
    B, N, E = 2, 8, 16

    key = jax.random.PRNGKey(0)
    kx, ke, kp = jax.random.split(key, 3)
    X = jax.random.normal(kx, (B, window_size, N), jnp.float32)
    edge_index = jax.random.randint(ke, (B, 2, E), 0, N, jnp.int32)
    params = init_params(kp, window_size, n_layers, hidden_dim, K)

    fwd = jax.jit(functools.partial(
        gcn_forward, window_size=window_size, n_layers=n_layers,
        hidden_dim=hidden_dim, K=K))
    out, h = fwd(X, edge_index, params)
    jax.block_until_ready((out, h))

    assert out.shape == (B, N)
    assert h.shape == (B * N, hidden_dim)

    out_ref, h_ref = gcn_reference(X, edge_index, params, window_size=window_size,
                                   n_layers=n_layers, hidden_dim=hidden_dim, K=K)
    assert jnp.allclose(out, out_ref, atol=2e-2, rtol=2e-2), "out mismatch vs reference"
    assert jnp.allclose(h, h_ref, atol=2e-2, rtol=2e-2), "h mismatch vs reference"

    print("KERNEL_OK")
</pallas_src>

<mosaic_0001>
module attributes {stable_mosaic.version = 11 : i64} {
  func.func private @main(%arg0: i32) attributes {dimension_semantics = [#tpu.dimension_semantics<core_parallel>], iteration_bounds = array<i64: 2>, tpu.core_type = #tpu.core_type<sc_scalar_subcore>, window_params = []} {
    return
  }
}

module attributes {stable_mosaic.version = 11 : i64} {
  func.func private @main(%arg0: i32) attributes {dimension_semantics = [#tpu.dimension_semantics<core_parallel>], iteration_bounds = array<i64: 2>, tpu.core_type = #tpu.core_type<sc_scalar_subcore>, window_params = []} {
    return
  }
}

module attributes {stable_mosaic.version = 11 : i64} {
  func.func @_gcn_fused_kernel(%arg0: i32, %arg1: memref<1x8x8xbf16, #tpu.memory_space<vmem>>, %arg2: memref<1x8x5xf32, #tpu.memory_space<vmem>>, %arg3: memref<10x32xbf16, #tpu.memory_space<vmem>>, %arg4: memref<1x32xf32, #tpu.memory_space<vmem>>, %arg5: memref<64x32xbf16, #tpu.memory_space<vmem>>, %arg6: memref<1x32xf32, #tpu.memory_space<vmem>>, %arg7: memref<64x32xbf16, #tpu.memory_space<vmem>>, %arg8: memref<1x32xf32, #tpu.memory_space<vmem>>, %arg9: memref<1x32xf32, #tpu.memory_space<vmem>>, %arg10: memref<1x1xf32, #tpu.memory_space<vmem>>, %arg11: memref<1x8x32xf32, #tpu.memory_space<vmem>>, %arg12: memref<1x8x1xf32, #tpu.memory_space<vmem>>) attributes {dimension_semantics = [#tpu.dimension_semantics<parallel>], iteration_bounds = array<i64: 2>, scalar_prefetch = 0 : i64, scratch_operands = 0 : i64, tpu.core_type = #tpu.core_type<tc>, window_params = [{transform_indices = @transform_0, window_bounds = array<i64: 1, 8, 8>}, {transform_indices = @transform_1, window_bounds = array<i64: 1, 8, 5>}, {pipeline_mode = #tpu.pipeline_mode<synchronous>, transform_indices = @transform_2, window_bounds = array<i64: 10, 32>}, {pipeline_mode = #tpu.pipeline_mode<synchronous>, transform_indices = @transform_3, window_bounds = array<i64: 1, 32>}, {pipeline_mode = #tpu.pipeline_mode<synchronous>, transform_indices = @transform_4, window_bounds = array<i64: 64, 32>}, {pipeline_mode = #tpu.pipeline_mode<synchronous>, transform_indices = @transform_5, window_bounds = array<i64: 1, 32>}, {pipeline_mode = #tpu.pipeline_mode<synchronous>, transform_indices = @transform_6, window_bounds = array<i64: 64, 32>}, {pipeline_mode = #tpu.pipeline_mode<synchronous>, transform_indices = @transform_7, window_bounds = array<i64: 1, 32>}, {pipeline_mode = #tpu.pipeline_mode<synchronous>, transform_indices = @transform_8, window_bounds = array<i64: 1, 32>}, {pipeline_mode = #tpu.pipeline_mode<synchronous>, transform_indices = @transform_9, window_bounds = array<i64: 1, 1>}, {transform_indices = @transform_10, window_bounds = array<i64: 1, 8, 32>}, {transform_indices = @transform_11, window_bounds = array<i64: 1, 8, 1>}]} {
    %c0 = arith.constant 0 : index
    %c0_0 = arith.constant 0 : index
    %c0_1 = arith.constant 0 : index
    %0 = vector.load %arg1[%c0, %c0_0, %c0_1] : memref<1x8x8xbf16, #tpu.memory_space<vmem>>, vector<1x8x8xbf16>
    %1 = vector.shape_cast %0 : vector<1x8x8xbf16> to vector<8x8xbf16>
    %c0_2 = arith.constant 0 : index
    %c0_3 = arith.constant 0 : index
    %c0_4 = arith.constant 0 : index
    %2 = vector.load %arg2[%c0_2, %c0_3, %c0_4] : memref<1x8x5xf32, #tpu.memory_space<vmem>>, vector<1x8x5xf32>
    %3 = vector.shape_cast %2 : vector<1x8x5xf32> to vector<8x5xf32>
    %4 = arith.truncf %3 : vector<8x5xf32> to vector<8x5xbf16>
    %cst = arith.constant dense<0.000000e+00> : vector<8x5xf32>
    %5 = tpu.matmul %1, %4, %cst {dimension_numbers = #tpu.dot_dimension_numbers<[1], [0], [0], [1], [0, 0, 1, 1], [], []>} : vector<8x8xbf16>, vector<8x5xbf16>, vector<8x5xf32> -> vector<8x5xf32>
    %6 = arith.truncf %5 : vector<8x5xf32> to vector<8x5xbf16>
    %7 = tpu.concatenate %4, %6 in 1 : vector<8x5xbf16>, vector<8x5xbf16> -> vector<8x10xbf16>
    %c0_5 = arith.constant 0 : index
    %c0_6 = arith.constant 0 : index
    %8 = vector.load %arg3[%c0_5, %c0_6] : memref<10x32xbf16, #tpu.memory_space<vmem>>, vector<10x32xbf16>
    %cst_7 = arith.constant dense<0.000000e+00> : vector<8x32xf32>
    %9 = tpu.matmul %7, %8, %cst_7 {dimension_numbers = #tpu.dot_dimension_numbers<[1], [0], [0], [1], [0, 0, 1, 1], [], []>} : vector<8x10xbf16>, vector<10x32xbf16>, vector<8x32xf32> -> vector<8x32xf32>
    %c0_8 = arith.constant 0 : index
    %c0_9 = arith.constant 0 : index
    %10 = vector.load %arg4[%c0_8, %c0_9] : memref<1x32xf32, #tpu.memory_space<vmem>>, vector<1x32xf32>
    %11 = vector.broadcast %10 : vector<1x32xf32> to vector<8x32xf32>
    %12 = arith.addf %9, %11 : vector<8x32xf32>
    %13 = math.tanh %12 : vector<8x32xf32>
    %14 = arith.truncf %13 : vector<8x32xf32> to vector<8x32xbf16>
    %cst_10 = arith.constant dense<0.000000e+00> : vector<8x32xf32>
    %15 = tpu.matmul %1, %14, %cst_10 {dimension_numbers = #tpu.dot_dimension_numbers<[1], [0], [0], [1], [0, 0, 1, 1], [], []>} : vector<8x8xbf16>, vector<8x32xbf16>, vector<8x32xf32> -> vector<8x32xf32>
    %16 = arith.truncf %15 : vector<8x32xf32> to vector<8x32xbf16>
    %17 = tpu.concatenate %14, %16 in 1 : vector<8x32xbf16>, vector<8x32xbf16> -> vector<8x64xbf16>
    %c0_11 = arith.constant 0 : index
    %c0_12 = arith.constant 0 : index
    %18 = vector.load %arg5[%c0_11, %c0_12] : memref<64x32xbf16, #tpu.memory_space<vmem>>, vector<64x32xbf16>
    %cst_13 = arith.constant dense<0.000000e+00> : vector<8x32xf32>
    %19 = tpu.matmul %17, %18, %cst_13 {dimension_numbers = #tpu.dot_dimension_numbers<[1], [0], [0], [1], [0, 0, 1, 1], [], []>} : vector<8x64xbf16>, vector<64x32xbf16>, vector<8x32xf32> -> vector<8x32xf32>
    %c0_14 = arith.constant 0 : index
    %c0_15 = arith.constant 0 : index
    %20 = vector.load %arg6[%c0_14, %c0_15] : memref<1x32xf32, #tpu.memory_space<vmem>>, vector<1x32xf32>
    %21 = vector.broadcast %20 : vector<1x32xf32> to vector<8x32xf32>
    %22 = arith.addf %19, %21 : vector<8x32xf32>
    %23 = math.tanh %22 : vector<8x32xf32>
    %24 = arith.truncf %23 : vector<8x32xf32> to vector<8x32xbf16>
    %cst_16 = arith.constant dense<0.000000e+00> : vector<8x32xf32>
    %25 = tpu.matmul %1, %24, %cst_16 {dimension_numbers = #tpu.dot_dimension_numbers<[1], [0], [0], [1], [0, 0, 1, 1], [], []>} : vector<8x8xbf16>, vector<8x32xbf16>, vector<8x32xf32> -> vector<8x32xf32>
    %26 = arith.truncf %25 : vector<8x32xf32> to vector<8x32xbf16>
    %27 = tpu.concatenate %24, %26 in 1 : vector<8x32xbf16>, vector<8x32xbf16> -> vector<8x64xbf16>
    %c0_17 = arith.constant 0 : index
    %c0_18 = arith.constant 0 : index
    %28 = vector.load %arg7[%c0_17, %c0_18] : memref<64x32xbf16, #tpu.memory_space<vmem>>, vector<64x32xbf16>
    %cst_19 = arith.constant dense<0.000000e+00> : vector<8x32xf32>
    %29 = tpu.matmul %27, %28, %cst_19 {dimension_numbers = #tpu.dot_dimension_numbers<[1], [0], [0], [1], [0, 0, 1, 1], [], []>} : vector<8x64xbf16>, vector<64x32xbf16>, vector<8x32xf32> -> vector<8x32xf32>
    %c0_20 = arith.constant 0 : index
    %c0_21 = arith.constant 0 : index
    %30 = vector.load %arg8[%c0_20, %c0_21] : memref<1x32xf32, #tpu.memory_space<vmem>>, vector<1x32xf32>
    %31 = vector.broadcast %30 : vector<1x32xf32> to vector<8x32xf32>
    %32 = arith.addf %29, %31 : vector<8x32xf32>
    %33 = math.tanh %32 : vector<8x32xf32>
    %c0_22 = arith.constant 0 : index
    %c0_23 = arith.constant 0 : index
    %c0_24 = arith.constant 0 : index
    %34 = vector.load %arg11[%c0_22, %c0_23, %c0_24] : memref<1x8x32xf32, #tpu.memory_space<vmem>>, vector<1x8x32xf32>
    %35 = vector.shape_cast %34 : vector<1x8x32xf32> to vector<8x32xf32>
    %36 = vector.shape_cast %33 : vector<8x32xf32> to vector<1x8x32xf32>
    tpu.vector_store %arg11[%c0_22, %c0_23, %c0_24], %36 {strides = array<i32>} : memref<1x8x32xf32, #tpu.memory_space<vmem>>, vector<1x8x32xf32>,
    %c0_25 = arith.constant 0 : index
    %c0_26 = arith.constant 0 : index
    %37 = vector.load %arg9[%c0_25, %c0_26] : memref<1x32xf32, #tpu.memory_space<vmem>>, vector<1x32xf32>
    %38 = vector.broadcast %37 : vector<1x32xf32> to vector<8x32xf32>
    %39 = arith.mulf %33, %38 : vector<8x32xf32>
    %cst_27 = arith.constant dense<0.000000e+00> : vector<8xf32>
    %40 = vector.multi_reduction <add>, %39, %cst_27 [1] : vector<8x32xf32> to vector<8xf32>
    %41 = vector.shape_cast %40 : vector<8xf32> to vector<8x1xf32>
    %c0_28 = arith.constant 0 : index
    %c0_29 = arith.constant 0 : index
    %42 = vector.load %arg10[%c0_28, %c0_29] : memref<1x1xf32, #tpu.memory_space<vmem>>, vector<1x1xf32>
    %43 = vector.broadcast %42 : vector<1x1xf32> to vector<8x1xf32>
    %44 = arith.addf %41, %43 : vector<8x1xf32>
    %c0_30 = arith.constant 0 : index
    %c0_31 = arith.constant 0 : index
    %c0_32 = arith.constant 0 : index
    %45 = vector.load %arg12[%c0_30, %c0_31, %c0_32] : memref<1x8x1xf32, #tpu.memory_space<vmem>>, vector<1x8x1xf32>
    %46 = vector.shape_cast %45 : vector<1x8x1xf32> to vector<8x1xf32>
    %47 = vector.shape_cast %44 : vector<8x1xf32> to vector<1x8x1xf32>
    tpu.vector_store %arg12[%c0_30, %c0_31, %c0_32], %47 {strides = array<i32>} : memref<1x8x1xf32, #tpu.memory_space<vmem>>, vector<1x8x1xf32>,
    return
  }
  func.func @transform_0(%arg0: i32) -> (i32, i32, i32) {
    %c0_i32 = arith.constant 0 : i32
    %c0_i32_0 = arith.constant 0 : i32
    %c0_i32_1 = arith.constant 0 : i32
    return %arg0, %c0_i32, %c0_i32_0 : i32, i32, i32
  }
  func.func @transform_1(%arg0: i32) -> (i32, i32, i32) {
    %c0_i32 = arith.constant 0 : i32
    %c0_i32_0 = arith.constant 0 : i32
    %c0_i32_1 = arith.constant 0 : i32
    return %arg0, %c0_i32, %c0_i32_0 : i32, i32, i32
  }
  func.func @transform_2(%arg0: i32) -> (i32, i32) {
    %c0_i32 = arith.constant 0 : i32
    %c0_i32_0 = arith.constant 0 : i32
    %c0_i32_1 = arith.constant 0 : i32
    return %c0_i32, %c0_i32_0 : i32, i32
  }
  func.func @transform_3(%arg0: i32) -> (i32, i32) {
    %c0_i32 = arith.constant 0 : i32
    %c0_i32_0 = arith.constant 0 : i32
    %c0_i32_1 = arith.constant 0 : i32
    return %c0_i32, %c0_i32_0 : i32, i32
  }
  func.func @transform_4(%arg0: i32) -> (i32, i32) {
    %c0_i32 = arith.constant 0 : i32
    %c0_i32_0 = arith.constant 0 : i32
    %c0_i32_1 = arith.constant 0 : i32
    return %c0_i32, %c0_i32_0 : i32, i32
  }
  func.func @transform_5(%arg0: i32) -> (i32, i32) {
    %c0_i32 = arith.constant 0 : i32
    %c0_i32_0 = arith.constant 0 : i32
    %c0_i32_1 = arith.constant 0 : i32
    return %c0_i32, %c0_i32_0 : i32, i32
  }
  func.func @transform_6(%arg0: i32) -> (i32, i32) {
    %c0_i32 = arith.constant 0 : i32
    %c0_i32_0 = arith.constant 0 : i32
    %c0_i32_1 = arith.constant 0 : i32
    return %c0_i32, %c0_i32_0 : i32, i32
  }
  func.func @transform_7(%arg0: i32) -> (i32, i32) {
    %c0_i32 = arith.constant 0 : i32
    %c0_i32_0 = arith.constant 0 : i32
    %c0_i32_1 = arith.constant 0 : i32
    return %c0_i32, %c0_i32_0 : i32, i32
  }
  func.func @transform_8(%arg0: i32) -> (i32, i32) {
    %c0_i32 = arith.constant 0 : i32
    %c0_i32_0 = arith.constant 0 : i32
    %c0_i32_1 = arith.constant 0 : i32
    return %c0_i32, %c0_i32_0 : i32, i32
  }
  func.func @transform_9(%arg0: i32) -> (i32, i32) {
    %c0_i32 = arith.constant 0 : i32
    %c0_i32_0 = arith.constant 0 : i32
    %c0_i32_1 = arith.constant 0 : i32
    return %c0_i32, %c0_i32_0 : i32, i32
  }
  func.func @transform_10(%arg0: i32) -> (i32, i32, i32) {
    %c0_i32 = arith.constant 0 : i32
    %c0_i32_0 = arith.constant 0 : i32
    %c0_i32_1 = arith.constant 0 : i32
    return %arg0, %c0_i32, %c0_i32_0 : i32, i32, i32
  }
  func.func @transform_11(%arg0: i32) -> (i32, i32, i32) {
    %c0_i32 = arith.constant 0 : i32
    %c0_i32_0 = arith.constant 0 : i32
    %c0_i32_1 = arith.constant 0 : i32
    return %arg0, %c0_i32, %c0_i32_0 : i32, i32, i32
  }
}

</mosaic_0001>

<bundles_post_ra>
// kernel: gcn_forward.1
= control target key start
LH: loop header
LB: loop body
LE: loop exit
PB: predicated region body
PF: predicated region fallthrough
CT: control target
= control target key end

     0   :  { %s1415_s0 = inlined_call_operand.vmem [shape: bf16[2,8,8], index: 0, kind: input, shape index: {}]   ;;  %s1416_s1 = inlined_call_operand.vmem [shape: f32[2,8,5], index: 1, kind: input, shape index: {}]   ;;  %s1417_s2 = inlined_call_operand.vmem [shape: bf16[10,32], index: 2, kind: input, shape index: {}]   ;;  %s1418_s3 = inlined_call_operand.vmem [shape: f32[1,32], index: 3, kind: input, shape index: {}]   ;;  %s1419_s4 = inlined_call_operand.vmem [shape: bf16[64,32], index: 4, kind: input, shape index: {}]   ;;  %s1420_s5 = inlined_call_operand.vmem [shape: f32[1,32], index: 5, kind: input, shape index: {}]   ;;  %s1421_s6 = inlined_call_operand.vmem [shape: bf16[64,32], index: 6, kind: input, shape index: {}]   ;;  %s1422_s7 = inlined_call_operand.vmem [shape: f32[1,32], index: 7, kind: input, shape index: {}]   ;;  %s1423_s8 = inlined_call_operand.vmem [shape: f32[1,32], index: 8, kind: input, shape index: {}]   ;;  %s1424_s9 = inlined_call_operand.<no memory space> [shape: f32[1,1], index: 9, kind: input, shape index: {}]   ;;  %s1425_s10 = inlined_call_operand.hbm [shape: f32[2,8,32], index: 10, kind: output, shape index: {0}]   ;;  %s1426_s11 = inlined_call_operand.vmem [shape: f32[2,8,1], index: 11, kind: output, shape index: {1}]  }
   0x1   :  { %1428 = sst [smem:[#allocation6_spill]] %s1415_s0  ;;  %v17_v0 = vstv %s1424_s9 }
   0x2   :  { %1429 = sst [smem:[#allocation7_spill]] %s1416_s1  ;;  %18 = vst [vmem:[#allocation2] sm:$0x1] %v17_v0 }
   0x3   :  { %19 = vsyncpa [#allocation4], 0 }
   0x4   :  { %21 = vsyncpa [#allocation4 + $0x1], 0  ;;  %s1225_s19 = smov 0   ;;  %s1227_s20 = smov 0  }
   0x5   :  { %s1229_s21 = smov 0   ;;  %s1231_s22 = smov 0  }
   0x6 LB: > { %s1246_s9 = sadd.s32 4294967295, %s1155_s22   ;;  %s937_s23 = sadd.s32 4294967294, %s1155_s22   ;;  %s1155_s22 = sphi %s1231_s22, %s1438_s22   ;;  %s1151_s21 = sphi %s1229_s21, %s1437_s21   ;;  %s1147_s20 = sphi %s1227_s20, %s1436_s20   ;;  %s1143_s19 = sphi %s1225_s19, %s1435_s19  }
   0x7   : > { %s1250_s24 = sadd.s32 1, %s1155_s22   ;;  %s254_s25 = sadd.s32 1, %s1151_s21 }
   0x8   : > { %s251_s26 = ssub.s32 %s1155_s22, %s1250_s24  ;;  %p264_p0 = scmp.ne.s32.totalorder %s1151_s21, %s1147_s20 }
   0x9   : > { %p252_p1 = scmp.eq.s32.totalorder %s251_s26, 0  ;;  %p265_p2 = scmp.eq.s32.totalorder %s1246_s9, 1 }
   0xa   : > { %p270_p3 = scmp.ne.s32.totalorder %s1147_s20, %s1143_s19  ;;  %p271_p4 = scmp.eq.s32.totalorder %s937_s23, 1 }
   0xb   : > { %s1261_s27 = scalar_select %p252_p1, %s1151_s21, %s254_s25  }
   0xc   : > { %p1263_p5 = por %p265_p2, %p264_p0  ;;  %p1267_p6 = por %p271_p4, %p270_p3 }
   0xd   : > { %p940_p7 = scmp.ge.s32.totalorder %s1155_s22, 1  ;;  %p353_p8 = scmp.lt.s32.totalorder %s1155_s22, 3 }
   0xf   : > { %p354_p9 = pnand %p940_p7, %p353_p8 }
  0x10   : > { %p400_p10 = scmp.lt.s32.totalorder (!%p354_p9), %s1246_s9, 1  ;;  %v1157_v1 = vmov (!%p354_p9), 0.0   ;;  %vm1158_vm0 = vmmov (!%p354_p9), 0   ;;  %s1432_s1 = sld [smem:[#allocation7_spill]] (!%p354_p9)  ;;  %vm420_vm1 = vcmask (!%p354_p9), 1043456   ;;  %vm416_vm2 = vcmask (!%p354_p9), 64512  }
  0x11   : > { %357 = sbr.rel (%p354_p9) target bundleno = 1860 (0x744), region = 60  ;;  %987 = vmatprep.subr.bf16.mxu1 (!%p354_p9), %v1157_v1  ;;  %989 = vmatprep.mubr.msk.bf16.mxu1 (!%p354_p9), %vm1158_vm0, %v1157_v1  ;;  %s1433_s0 = sld [smem:[#allocation6_spill]] (!%p354_p9)  ;;  %v1078_v6 = vld [vmem:[%s1417_s2] sm:$0x1f] (!%p354_p9)   ;;  %vm488_vm3 = vcmask (!%p354_p9), 1044480   ;;  %vm468_vm4 = vcmask (!%p354_p9), 39936  }
  0x12   : > { %999 = vmatprep.subr.bf16.mxu0 (!%p354_p9), %v1157_v1  ;;  %1001 = vmatprep.mubr.msk.bf16.mxu0 (!%p354_p9), %vm1158_vm0, %v1157_v1  ;;  %v490_v7 = vsel (!%p354_p9), %vm488_vm3, %v1078_v6, 0  ;;  %vm485_vm5 = vcmask (!%p354_p9), 80896   ;;  %v946_v15 = vld [vmem:[%s1418_s3] ss:$0 sm:$0xff] (!%p354_p9)  ;;  %v1080_v25 = vld [vmem:[%s1419_s4 + $0x8] sm:$0xff] (!%p354_p9)   ;;  %v1081_v26 = vld [vmem:[%s1419_s4 + $0x10] sm:$0xff] (!%p354_p9)  }
  0x13   : > { %v1079_v24 = vld [vmem:[%s1419_s4] sm:$0xff] (!%p354_p9)   ;;  %v1082_v27 = vld [vmem:[%s1419_s4 + $0x18] sm:$0xff] (!%p354_p9)   ;;  %s1160_s15 = smov (!%p354_p9), 32   ;;  %vm581_vm6 = vcmask (!%p354_p9), 261120   ;;  %vm623_vm7 = vcmask (!%p354_p9), 523264   ;;  %v1084_v45 = vld [vmem:[%s1421_s6 + $0x8] sm:$0xff] (!%p354_p9)  }
  0x14   : > { %v950_v35 = vld [vmem:[%s1420_s5] ss:$0 sm:$0xff] (!%p354_p9)  ;;  %v1085_v46 = vld [vmem:[%s1421_s6 + $0x10] sm:$0xff] (!%p354_p9)   ;;  %v1086_v47 = vld [vmem:[%s1421_s6 + $0x18] sm:$0xff] (!%p354_p9)   ;;  %s391_s25 = sand.u32 (!%p354_p9), 1, %s1147_s20  }
  0x15   : > { %v1083_v44 = vld [vmem:[%s1421_s6] sm:$0xff] (!%p354_p9)  }
  0x16   : > { %v957_v55 = vld [vmem:[%s1422_s7] ss:$0 sm:$0xff] (!%p354_p9) }
  0x17   : > { %v963_v61 = vld [vmem:[%s1423_s8] ss:$0 sm:$0xff] (!%p354_p9) }
  0x18   : > { %s1278_s30 = scalar_select %p400_p10, %s1246_s9, 1 }
  0x1a   : > { %s1427_s12 = sshll.u32 %s1278_s30, 3  ;;  %s942_s13 = sshll.u32 %s1278_s30, 2 }
  0x1b   : > { %s407_s16 = scalar_lea.vmem %s1432_s1, %s1427_s12  ;;  %s403_s23 = scalar_lea.vmem %s1433_s0, %s942_s13 }
  0x1c   : > { %v414_v2 = vld [vmem:[%s407_s16] sm:$0xff]  ;;  %s1159_s13 = smov 5   ;;  %s966_s16 = sshll.u32 %s1246_s9, 7 }
  0x1d   : > { %v415_v3 = vpack.c.bf16 %v414_v2, %v414_v2  ;;  %v1294_v5 = vld [vmem:[%s403_s23] sm:$0xf]  ;;  %s1374_s12 = scalar_lea.hbm %s1425_s10, %s966_s16  ;;  %s822_s0 = scalar_lea.sflag [#allocation4], %s391_s25 }
  0x1f   : > { %v422_v4 = vsel %vm420_vm1, %v415_v3, 0 }
  0x20   : > { %988 = vmatpush3.bf16.msra.mxu1 %v422_v4 }
  0x21   : > { %993 = vmatprep.subr.bf16.mxu1 %v1157_v1 }
  0x23   : > { %990 = vmatmul.mubr.msk.bf16.vlgmr.msra.gmra.mrb[0].mxu1 %vm416_vm2, %v1294_v5 }
  0x24   : > { %995 = vmatprep.mubr.msk.bf16.mxu1 %vm1158_vm0, %v1157_v1  ;;  %994 = vmatpush3.bf16.msra.mxu1 %v490_v7 }
  0x25   : > { %1005 = vmatprep.subr.bf16.mxu1 %v1157_v1 }
  0xf6   : > { %v458_v8 = vpop.f32.mrb[0].mxu1 }
  0xf7   : > { %v464_v9 = vpack.c.bf16 %v458_v8, %v458_v8  ;;  %v991_v10 = vpop.f32.mrb[1].mxu1 }
  0xf8   : > { %v461_v11 = vpop.f32.mrb[2].mxu1 }
  0xf9   : > { %466 = vrot.lane.b32.xlu0 %v464_v9, %s1159_s13  ;;  %v992_v12 = vpop.f32.mrb[3].mxu1 }
 0x16b   : > { %v467_v13 = vpop.permute.xlu0 %466 }
 0x16c   : > { %v470_v14 = vsel %vm468_vm4, %v415_v3, %v467_v13 }
 0x16d   : > { %996 = vmatmul.mubr.msk.bf16.vlgmr.msra.gmra.mrb[4].mxu1 %vm485_vm5, %v470_v14 }
 0x16e   : > { %1013 = vmatprep.mubr.msk.bf16.mxu1 %vm1158_vm0, %v1157_v1  ;;  %1006 = vmatpush3.bf16.msra.mxu1 %v1079_v24 }
 0x16f   : > { %1007 = vmatprep.subr.bf16.mxu1 %v1157_v1 }
 0x172   : > { %1008 = vmatpush3.bf16.msra.mxu1 %v1080_v25 }
 0x173   : > { %1009 = vmatprep.subr.bf16.mxu1 %v1157_v1 }
 0x176   : > { %1010 = vmatpush3.bf16.msra.mxu1 %v1081_v26 }
 0x177   : > { %1011 = vmatprep.subr.bf16.mxu1 %v1157_v1 }
 0x17a   : > { %1012 = vmatpush3.bf16.msra.mxu1 %v1082_v27 }
 0x240   : > { %v526_v16 = vpop.f32.mrb[4].mxu1 }
 0x241   : > { %v527_v17 = vadd.f32 %v946_v15, %v526_v16  ;;  %v997_v18 = vpop.f32.mrb[5].mxu1 }
 0x242   : > { %v529_v19 = vpop.f32.mrb[6].mxu1 }
 0x243   : > { %1087 = vtanh.f32 %v527_v17  ;;  %v998_v20 = vpop.f32.mrb[7].mxu1 }
 0x24d   : > { %v1088_v21 = vpop.eup %1087 }
 0x24e   : > { %v533_v22 = vpack.c.bf16 %v1088_v21, %v1088_v21 }
 0x250   : > { %v535_v23 = vsel %vm420_vm1, %v533_v22, 0 }
 0x251   : > { %1000 = vmatpush3.bf16.msra.mxu0 %v535_v23 }
 0x252   : > { %1017 = vmatprep.subr.bf16.mxu0 %v1157_v1 }
 0x254   : > { %1002 = vmatmul.mubr.msk.bf16.vlgmr.msra.gmra.mrb[0].mxu0 %vm416_vm2, %v1294_v5 }
 0x255   : > { %1019 = vmatprep.mubr.msk.bf16.mxu0 %vm1158_vm0, %v1157_v1 }
 0x327   : > { %v571_v28 = vpop.f32.mrb[0].mxu0 }
 0x328   : > { %v577_v29 = vpack.c.bf16 %v571_v28, %v571_v28  ;;  %v1003_v30 = vpop.f32.mrb[1].mxu0 }
 0x329   : > { %v574_v31 = vpop.f32.mrb[2].mxu0 }
 0x32a   : > { %579 = vrot.lane.b32.xlu0 %v577_v29, %s1160_s15  ;;  %v1004_v32 = vpop.f32.mrb[3].mxu0 }
 0x39c   : > { %v580_v33 = vpop.permute.xlu0 %579 }
 0x39d   : > { %v583_v34 = vsel %vm581_vm6, %v533_v22, %v580_v33 }
 0x39e   : > { %1014 = vmatmul.mubr.msk.bf16.vlgmr.msra.gmra.mrb[8].mxu1 %vm623_vm7, %v583_v34 }
 0x471   : > { %v660_v36 = vpop.f32.mrb[8].mxu1 }
 0x472   : > { %v661_v37 = vadd.f32 %v950_v35, %v660_v36  ;;  %v1015_v38 = vpop.f32.mrb[9].mxu1 }
 0x473   : > { %v663_v39 = vpop.f32.mrb[10].mxu1 }
 0x474   : > { %1089 = vtanh.f32 %v661_v37  ;;  %v1016_v40 = vpop.f32.mrb[11].mxu1 }
 0x47e   : > { %v1090_v41 = vpop.eup %1089 }
 0x47f   : > { %v667_v42 = vpack.c.bf16 %v1090_v41, %v1090_v41 }
 0x481   : > { %v669_v43 = vsel %vm420_vm1, %v667_v42, 0 }
 0x482   : > { %1018 = vmatpush3.bf16.msra.mxu0 %v669_v43 }
 0x483   : > { %1023 = vmatprep.subr.bf16.mxu0 %v1157_v1 }
 0x485   : > { %1020 = vmatmul.mubr.msk.bf16.vlgmr.msra.gmra.mrb[4].mxu0 %vm416_vm2, %v1294_v5 }
 0x486   : > { %1031 = vmatprep.mubr.msk.bf16.mxu0 %vm1158_vm0, %v1157_v1  ;;  %1024 = vmatpush3.bf16.msra.mxu0 %v1083_v44 }
 0x487   : > { %1025 = vmatprep.subr.bf16.mxu0 %v1157_v1 }
 0x48a   : > { %1026 = vmatpush3.bf16.msra.mxu0 %v1084_v45 }
 0x48b   : > { %1027 = vmatprep.subr.bf16.mxu0 %v1157_v1 }
 0x48e   : > { %1028 = vmatpush3.bf16.msra.mxu0 %v1085_v46 }
 0x48f   : > { %1029 = vmatprep.subr.bf16.mxu0 %v1157_v1 }
 0x492   : > { %1030 = vmatpush3.bf16.msra.mxu0 %v1086_v47 }
 0x558   : > { %v705_v48 = vpop.f32.mrb[4].mxu0 }
 0x559   : > { %v711_v49 = vpack.c.bf16 %v705_v48, %v705_v48  ;;  %v1021_v50 = vpop.f32.mrb[5].mxu0 }
 0x55a   : > { %v708_v51 = vpop.f32.mrb[6].mxu0 }
 0x55b   : > { %713 = vrot.lane.b32.xlu1 %v711_v49, %s1160_s15  ;;  %v1022_v52 = vpop.f32.mrb[7].mxu0  ;;  %s941_s15 = sshll.u32 %s391_s25, 3 }
 0x55c   : > { %s393_s14 = scalar_lea.vmem [#allocation3], %s941_s15  ;;  %s1161_s15 = smov [#allocation3]  }
 0x55d   : > { %s839_s17 = sshll.u32 %s393_s14, 4  ;;  %s1097_s26 = sshll.u32 %s1161_s15, 4  ;;  %s840_s17 = int_to_ptr.vmem [resolvable:$true] %s839_s17  ;;  %s1098_s26 = int_to_ptr.vmem [resolvable:$false] %s1097_s26 }
 0x55e   : > { %s1093_s1 = scalar_lea.vmem %s840_s17, 128  ;;  %s1099_s13 = scalar_lea.vmem %s1098_s26, 256 }
 0x55f   : > { %p1094_p11 = scmp.ne.s32.totalorder %s840_s17, %s1093_s1  ;;  %p1100_p0 = scmp.lt.s32.totalorder %s840_s17, %s1098_s26 }
 0x560   : > { %p1101_p1 = scmp.lt.s32.totalorder %s1099_s13, %s1093_s1 }
 0x561   : > { %p1095_p12 = pnand %p1094_p11, %p1263_p5 }
 0x562   : > { %p1102_p2 = por %p1101_p1, %p1100_p0 }
 0x563   : > { %p1096_p13 = pneg %p1095_p12 }
 0x565   : > { %p1103_p3 = pnand %p1102_p2, %p1096_p13 }
 0x5cd   : > { %v714_v53 = vpop.permute.xlu1 %713 }
 0x5ce   : > { %v716_v54 = vsel %vm581_vm6, %v667_v42, %v714_v53 }
 0x5cf   : > { %1032 = vmatmul.mubr.msk.bf16.vlgmr.msra.gmra.mrb[8].mxu0 %vm623_vm7, %v716_v54 }
 0x6a2   : > { %v792_v56 = vpop.f32.mrb[8].mxu0 }
 0x6a3   : > { %v793_v57 = vadd.f32 %v957_v55, %v792_v56  ;;  %v1033_v58 = vpop.f32.mrb[9].mxu0 }
 0x6a4   : > { %v795_v59 = vpop.f32.mrb[10].mxu0 }
 0x6a5   : > { %1091 = vtanh.f32 %v793_v57  ;;  %v1034_v60 = vpop.f32.mrb[11].mxu0 }
 0x6af   : > { %v1092_v62 = vpop.eup %1091 }
 0x6b0   : > { %v807_v63 = vmul.f32 %v1092_v62, %v963_v61  ;;  %799 = vst.msk [vmem:[%s393_s14] sm:$0xff] %vm581_vm6, %v1092_v62 }
 0x6b2   : > { %v808_v0 = vsel %vm581_vm6, %v807_v63, 0.0 }
 0x6b3   : > { %809 = vadd.xlane.f32.xlu1 %v808_v0 }
 0x6b4   : > { %1106 = shalt.err (!%p1103_p3)
}
 0x6b5   : > { %s1107_s9 = scalar_lea.hbm %s1374_s12, 128  ;;  %s1111_s16 = scalar_lea.hbm %s1425_s10, 256 }
 0x6b6   : > { %p1108_p4 = scmp.ne.s32.totalorder %s1374_s12, %s1107_s9  ;;  %p1112_p9 = scmp.lt.u32.totalorder %s1374_s12, %s1425_s10 }
 0x6b7   : > { %p1113_p10 = scmp.lt.u32.totalorder %s1111_s16, %s1107_s9  ;;  %p1115_p12 = scmp.lt.u32.totalorder %s1107_s9, %s1374_s12 }
 0x6b8   : > { %p1109_p7 = pnand %p1108_p4, %p1263_p5 }
 0x6b9   : > { %p1114_p11 = por %p1113_p10, %p1112_p9 }
 0x6ba   : > { %p1110_p8 = pneg %p1109_p7 }
 0x6bb   : > { %p1116_p13 = por %p1115_p12, %p1114_p11 }
 0x6bd   : > { %p1117_p0 = pnand %p1116_p13, %p1110_p8 }
 0x6bf   : > { %1120 = shalt.err (!%p1117_p0)
}
 0x6c0   : > { %1035 = dma.vmem_to_hbm [thread:$0]  (%p1263_p5), %s840_s17, 128, %s1374_s12, %s822_s0   ;;  %v964_v1 = vld [vmem:[#allocation2] ss:$0 sm:$0xff]  ;;  %vm819_vm8 = vcmask 7168  }
 0x6c1   : > { %s1434_s1 = sshll.u32 %s1278_s30, 3 }
 0x6c2   : > { %s411_s13 = scalar_lea.vmem %s1426_s11, %s1434_s1 }
 0x740   : > { %v810_v2 = vpop.xlane.xlu1 %809 }
 0x741   : > { %v818_v3 = vadd.f32 %v964_v1, %v810_v2 }
 0x743   : > { %820 = vst.msk [vmem:[%s411_s13] sm:$0xff] %vm819_vm8, %v818_v3 }
 0x744 PF: > { %p1041_p1 = scmp.ge.s32.totalorder %s1155_s22, 2  ;;  %s854_s9 = sand.u32 1, %s1143_s19  }
 0x745   : > { %s855_s28 = scalar_lea.sflag [#allocation4], %s854_s9 }
 0x746   : > { %p1038_p2 = pnand %p1041_p1, %p1267_p6 }
 0x748   : > { %1138 = dma.done.wait (!%p1038_p2), %s855_s28, 128  }
 0x749   : > { %1140 = vsyncadd (!%p1038_p2), %s855_s28, 4294967168  ;;  %p24_p5 = scmp.ge.s32.totalorder %s1250_s24, 4   ;;  %s1435_s19 = smov %s1147_s20 }
 0x74a   : > { %s1436_s20 = smov %s1151_s21  ;;  %s1437_s21 = smov %s1261_s27 }
 0x74b   : > { %s1438_s22 = smov %s1250_s24  ;;  %26 = sbr.rel (!%p24_p5) target bundleno = 6 (0x6), region = 110 }
 0x752   :  { %867 = vsyncpa [#allocation4], 1 }
 0x753   :  { %869 = vsyncpa [#allocation4 + $0x1], 1 }

</bundles_post_ra>
